<compile_context>
chip_gen: v6e
topology: v6e:2x2x1
jax: 0.10.0
libtpu: 0.0.40
codegen_flags: <defaults>
</compile_context>

<pallas_src>
import math

import jax
import jax.numpy as jnp
from jax.experimental import pallas as pl
from jax.experimental.pallas import tpu as pltpu


_LANE = 128     # lane (fast) axis quantum
_SUBLANE = 8    # sublane (slow) axis quantum


def _round_up(x, m):
    return ((x + m - 1) // m) * m


def _vmem_capacity_bytes():
    """Per-TensorCore VMEM capacity; conservative fallback if query fails."""
    try:
        return int(pltpu.get_tpu_info().vmem_capacity_bytes)
    except Exception:
        return 64 * 1024 * 1024   # v7x per-TC VMEM (smallest of the three gens)


def _mlp_kernel(x_ref, w1_ref, b1_ref, w2_ref, b2_ref, o_ref, acc_ref):
    """One (row tile, hidden tile) grid step of the fused MLP.

    Grid = (row tiles ["parallel"], hidden tiles ["arbitrary" reduction]).

    x_ref  : (tm, Din_p)   activation row tile (same block across hidden axis)
    w1_ref : (Din_p, th)   fc1 weight tile (x @ w1), matmul dtype (bf16/f32)
    b1_ref : (1, th)       fc1 bias tile (f32)
    w2_ref : (th, Dout_p)  fc2 weight tile
    b2_ref : (1, Dout_p)   fc2 bias (f32)
    o_ref  : (tm, Dout_p)  output row tile (written on last hidden step)
    acc_ref: (tm, Dout_p)  f32 accumulator scratch
    """
    k = pl.program_id(1)

    @pl.when(k == 0)
    def _():
        acc_ref[...] = jnp.zeros_like(acc_ref)

    mm_dtype = w1_ref.dtype

    # fc1 tile: bf16 (or f32) MXU inputs, f32 accumulation; bias add in f32.
    h = jnp.dot(x_ref[...].astype(mm_dtype), w1_ref[...],
                preferred_element_type=jnp.float32)
    h = h + b1_ref[...]

    # Exact GELU (erf form) in f32 — matches torch.nn.GELU() default.
    # erf lowers to the EUP/VPU path, off the MXU critical slot.
    h = 0.5 * h * (1.0 + jax.lax.erf(h * (1.0 / math.sqrt(2.0))))

    # fc2 partial sum over this hidden tile (MXU, f32 accumulate).
    acc_ref[...] += jnp.dot(h.astype(mm_dtype), w2_ref[...],
                            preferred_element_type=jnp.float32)

    # Dropout(p=0.0) / eval mode is the identity — nothing to apply.
    # TODO(synk): training-mode dropout (p > 0) would need pltpu.prng_* here.
    @pl.when(k == pl.num_programs(1) - 1)
    def _():
        o_ref[...] = (acc_ref[...] + b2_ref[...]).astype(o_ref.dtype)


def prepare_mlp_weights(w1, b1, w2, b2, *, matmul_dtype=jnp.bfloat16,
                        vmem_budget_bytes=None):
    """Pad/transpose weights ONCE to lane-dense kernel layout (cacheable).

    PyTorch nn.Linear layout in: w1 (H, Din), b1 (H,), w2 (Dout, H), b2 (Dout,).
    Returns ((w1_p, b1_p, w2_p, b2_p), dims) in (in, out)-major padded layout.
    """
    H, Din = w1.shape
    Dout, H2 = w2.shape
    assert H2 == H and b1.shape == (H,) and b2.shape == (Dout,)

    Din_p = _round_up(Din, _LANE)
    Dout_p = _round_up(Dout, _LANE)

    if vmem_budget_bytes is None:
        vmem_budget_bytes = int(0.6 * _vmem_capacity_bytes())
    w_bytes = jnp.dtype(matmul_dtype).itemsize

    # Choose hidden tile `th` so the (double-buffered) weight tiles stay within
    # ~half the VMEM budget.  n_h > 1 makes the hidden dim a reduction grid
    # axis with an f32 accumulator (fallback for large H, esp. on v7x).
    n_h = 1
    while True:
        th = _round_up(-(-H // n_h), _LANE)                 # ceil(H/n_h) -> lanes
        w_foot = 2 * w_bytes * (Din_p * th + th * Dout_p) + 2 * 4 * (th + Dout_p)
        if w_foot <= vmem_budget_bytes // 2 or th == _LANE:
            break
        n_h += 1
    H_p = th * n_h

    w1_p = jnp.zeros((Din_p, H_p), matmul_dtype).at[:Din, :H].set(
        w1.T.astype(matmul_dtype))
    w2_p = jnp.zeros((H_p, Dout_p), matmul_dtype).at[:H, :Dout].set(
        w2.T.astype(matmul_dtype))
    # Biases stay f32 (bias add + GELU in f32); padded cols are exactly zero,
    # so padded hidden columns contribute nothing through GELU and w2.
    b1_p = jnp.zeros((1, H_p), jnp.float32).at[0, :H].set(b1.astype(jnp.float32))
    b2_p = jnp.zeros((1, Dout_p), jnp.float32).at[0, :Dout].set(
        b2.astype(jnp.float32))

    dims = dict(Din=Din, H=H, Dout=Dout,
                Din_p=Din_p, H_p=H_p, Dout_p=Dout_p, th=th, n_h=n_h,
                w_foot=w_foot, vmem_budget_bytes=vmem_budget_bytes)
    return (w1_p, b1_p, w2_p, b2_p), dims


def mlp_apply(x, prepared):
    """Run the fused MLP on x (..., Din) with prepared (padded) weights."""
    (w1_p, b1_p, w2_p, b2_p), d = prepared
    orig_shape = x.shape
    Din, Dout = d["Din"], d["Dout"]
    assert orig_shape[-1] == Din, (orig_shape, Din)
    M = max(math.prod(orig_shape[:-1]) if len(orig_shape) > 1 else 1, 1)

    Din_p, Dout_p = d["Din_p"], d["Dout_p"]
    H_p, th, n_h = d["H_p"], d["th"], d["n_h"]

    out_dtype = x.dtype
    x_bytes = x.dtype.itemsize
    out_bytes = jnp.dtype(out_dtype).itemsize

    # --- row tile from the remaining VMEM budget after the weight tiles -----
    budget = d["vmem_budget_bytes"]
    remaining = max(budget - d["w_foot"], budget // 4)
    per_row = (2 * x_bytes * Din_p        # double-buffered x tile
               + 2 * out_bytes * Dout_p   # double-buffered out tile
               + 4 * Dout_p               # f32 accumulator scratch
               + 4 * th)                  # f32 hidden intermediate
    tm = max(_SUBLANE, remaining // per_row)
    tm = min(tm, 1024)
    # Keep >= 2 row tiles when possible so v7x's 2nd TensorCore has work.
    if M > _SUBLANE:
        tm = min(tm, _round_up(-(-M // 2), _SUBLANE))
    tm = min(tm, _round_up(M, _SUBLANE))
    if tm >= 256:
        tm = (tm // 256) * 256            # v6e/v7x MXU is 256-wide
    else:
        tm = max(_SUBLANE, (tm // _SUBLANE) * _SUBLANE)

    M_p = _round_up(M, tm)

    # --- x: avoid the padded copy entirely when shapes are already aligned --
    xf = x.reshape(M, Din)
    if M_p == M and Din_p == Din:
        x_p = xf
    else:
        x_p = jnp.zeros((M_p, Din_p), x.dtype).at[:M, :Din].set(xf)

    grid = (M_p // tm, n_h)

    cost = pl.CostEstimate(
        flops=2 * M * (Din_p * H_p + H_p * Dout_p),
        transcendentals=M * H_p,
        bytes_accessed=int(x_p.size * x_bytes
                           + w1_p.size * w1_p.dtype.itemsize
                           + w2_p.size * w2_p.dtype.itemsize
                           + b1_p.size * b1_p.dtype.itemsize
                           + b2_p.size * b2_p.dtype.itemsize
                           + M_p * Dout_p * out_bytes),
    )

    out_p = pl.pallas_call(
        _mlp_kernel,
        out_shape=jax.ShapeDtypeStruct((M_p, Dout_p), out_dtype),
        grid_spec=pltpu.PrefetchScalarGridSpec(
            num_scalar_prefetch=0,
            grid=grid,
            in_specs=[
                # activation row tile: resident across the hidden axis
                pl.BlockSpec((tm, Din_p), lambda i, k: (i, 0)),
                # weight / bias tiles: depend only on the hidden-tile index;
                # with n_h == 1 they are fully resident in VMEM (no re-DMA)
                pl.BlockSpec((Din_p, th), lambda i, k: (0, k)),
                pl.BlockSpec((1, th), lambda i, k: (0, k)),
                pl.BlockSpec((th, Dout_p), lambda i, k: (k, 0)),
                pl.BlockSpec((1, Dout_p), lambda i, k: (0, 0)),
            ],
            out_specs=pl.BlockSpec((tm, Dout_p), lambda i, k: (i, 0)),
            scratch_shapes=[pltpu.VMEM((tm, Dout_p), jnp.float32)],
        ),
        compiler_params=pltpu.CompilerParams(
            # row tiles independent -> shard across TCs; hidden axis is a
            # reduction into the accumulator -> arbitrary.
            dimension_semantics=("parallel", "arbitrary"),
            # generation-aware ceiling (v5e/v6e ~109 MiB, v7x ~54 MiB)
            vmem_limit_bytes=int(0.85 * _vmem_capacity_bytes()),
        ),
        cost_estimate=cost,
    )(x_p, w1_p, b1_p, w2_p, b2_p)

    out = out_p[:M, :Dout]
    return out.reshape(*orig_shape[:-1], Dout)


def mlp_forward(x, w1, b1, w2, b2, *, matmul_dtype=jnp.bfloat16):
    """Convenience wrapper: prepare weights (pad/transpose/cast) then apply.

    For repeated calls with the same weights, call prepare_mlp_weights once
    and reuse the result with mlp_apply (avoids per-call HBM round trips).
    """
    prepared = prepare_mlp_weights(w1, b1, w2, b2, matmul_dtype=matmul_dtype)
    return mlp_apply(x, prepared)


def _reference(x, w1, b1, w2, b2):
    xf = x.astype(jnp.float32)
    h = jnp.dot(xf, w1.T.astype(jnp.float32),
                precision=jax.lax.Precision.HIGHEST) + b1.astype(jnp.float32)
    h = 0.5 * h * (1.0 + jax.lax.erf(h / math.sqrt(2.0)))   # exact GELU
    return jnp.dot(h, w2.T.astype(jnp.float32),
                   precision=jax.lax.Precision.HIGHEST) + b2.astype(jnp.float32)


if __name__ == "__main__":
    # Mlp(in_features=32) -> hidden=32, out=32 (defaults); x: (batch=2, seq=8, 32)
    B, S, D_in = 2, 8, 32
    hidden = 32
    D_out = 32

    key = jax.random.PRNGKey(0)
    kx, kw1, kb1, kw2, kb2 = jax.random.split(key, 5)

    x = jax.random.normal(kx, (B, S, D_in), jnp.float32)

    # nn.Linear-style uniform init, PyTorch (out, in) layout.
    bound1 = 1.0 / math.sqrt(D_in)
    w1 = jax.random.uniform(kw1, (hidden, D_in), jnp.float32, -bound1, bound1)
    b1 = jax.random.uniform(kb1, (hidden,), jnp.float32, -bound1, bound1)
    bound2 = 1.0 / math.sqrt(hidden)
    w2 = jax.random.uniform(kw2, (D_out, hidden), jnp.float32, -bound2, bound2)
    b2 = jax.random.uniform(kb2, (D_out,), jnp.float32, -bound2, bound2)

    ref = _reference(x, w1, b1, w2, b2)

    # Default fast path: bf16 MXU inputs, f32 accumulation (weights prepared once).
    params_bf16 = prepare_mlp_weights(w1, b1, w2, b2)
    out_bf16 = jax.block_until_ready(mlp_apply(x, params_bf16))
    assert out_bf16.shape == (B, S, D_out), out_bf16.shape
    err_bf16 = float(jnp.max(jnp.abs(out_bf16 - ref)))
    assert err_bf16 < 5e-2, err_bf16

    # Exact f32 path: matches the PyTorch module numerics tightly.
    out_f32 = jax.block_until_ready(
        mlp_forward(x, w1, b1, w2, b2, matmul_dtype=jnp.float32))
    err_f32 = float(jnp.max(jnp.abs(out_f32 - ref)))
    assert jnp.allclose(out_f32, ref, atol=1e-4, rtol=1e-4), err_f32

    print("KERNEL_OK")
</pallas_src>

<mosaic_0001>
module attributes {stable_mosaic.version = 11 : i64} {
  func.func @_mlp_kernel(%arg0: i32, %arg1: i32, %arg2: memref<8x128xf32, #tpu.memory_space<vmem>>, %arg3: memref<128x128xbf16, #tpu.memory_space<vmem>>, %arg4: memref<1x128xf32, #tpu.memory_space<vmem>>, %arg5: memref<128x128xbf16, #tpu.memory_space<vmem>>, %arg6: memref<1x128xf32, #tpu.memory_space<vmem>>, %arg7: memref<8x128xf32, #tpu.memory_space<vmem>>, %arg8: memref<8x128xf32, #tpu.memory_space<vmem>>) attributes {dimension_semantics = [#tpu.dimension_semantics<parallel>, #tpu.dimension_semantics<arbitrary>], iteration_bounds = array<i64: 2, 1>, scalar_prefetch = 0 : i64, scratch_operands = 1 : i64, tpu.core_type = #tpu.core_type<tc>, window_params = [{transform_indices = @transform_0, window_bounds = array<i64: 8, 128>}, {transform_indices = @transform_1, window_bounds = array<i64: 128, 128>}, {transform_indices = @transform_2, window_bounds = array<i64: 1, 128>}, {transform_indices = @transform_3, window_bounds = array<i64: 128, 128>}, {pipeline_mode = #tpu.pipeline_mode<synchronous>, transform_indices = @transform_4, window_bounds = array<i64: 1, 128>}, {transform_indices = @transform_5, window_bounds = array<i64: 8, 128>}]} {
    %c0_i32 = arith.constant 0 : i32
    %0 = arith.cmpi eq, %arg1, %c0_i32 : i32
    %1 = arith.extui %0 : i1 to i32
    %c0_i32_0 = arith.constant 0 : i32
    %2 = arith.cmpi ne, %1, %c0_i32_0 : i32
    scf.if %2 {
      %cst_18 = arith.constant 0.000000e+00 : f32
      %27 = vector.broadcast %cst_18 : f32 to vector<8x128xf32>
      %c0_19 = arith.constant 0 : index
      %c0_20 = arith.constant 0 : index
      %28 = vector.load %arg8[%c0_19, %c0_20] : memref<8x128xf32, #tpu.memory_space<vmem>>, vector<8x128xf32>
      tpu.vector_store %arg8[%c0_19, %c0_20], %27 {strides = array<i32>} : memref<8x128xf32, #tpu.memory_space<vmem>>, vector<8x128xf32>,
    } else {
    }
    %c0 = arith.constant 0 : index
    %c0_1 = arith.constant 0 : index
    %3 = vector.load %arg2[%c0, %c0_1] : memref<8x128xf32, #tpu.memory_space<vmem>>, vector<8x128xf32>
    %4 = arith.truncf %3 : vector<8x128xf32> to vector<8x128xbf16>
    %c0_2 = arith.constant 0 : index
    %c0_3 = arith.constant 0 : index
    %5 = vector.load %arg3[%c0_2, %c0_3] : memref<128x128xbf16, #tpu.memory_space<vmem>>, vector<128x128xbf16>
    %cst = arith.constant dense<0.000000e+00> : vector<8x128xf32>
    %6 = tpu.matmul %4, %5, %cst {dimension_numbers = #tpu.dot_dimension_numbers<[1], [0], [0], [1], [0, 0, 1, 1], [], []>} : vector<8x128xbf16>, vector<128x128xbf16>, vector<8x128xf32> -> vector<8x128xf32>
    %c0_4 = arith.constant 0 : index
    %c0_5 = arith.constant 0 : index
    %7 = vector.load %arg4[%c0_4, %c0_5] : memref<1x128xf32, #tpu.memory_space<vmem>>, vector<1x128xf32>
    %8 = vector.broadcast %7 : vector<1x128xf32> to vector<8x128xf32>
    %9 = arith.addf %6, %8 : vector<8x128xf32>
    %cst_6 = arith.constant 5.000000e-01 : f32
    %10 = vector.broadcast %cst_6 : f32 to vector<8x128xf32>
    %11 = arith.mulf %10, %9 : vector<8x128xf32>
    %cst_7 = arith.constant 0.707106769 : f32
    %12 = vector.broadcast %cst_7 : f32 to vector<8x128xf32>
    %13 = arith.mulf %9, %12 : vector<8x128xf32>
    %14 = math.erf %13 : vector<8x128xf32>
    %cst_8 = arith.constant 1.000000e+00 : f32
    %15 = vector.broadcast %cst_8 : f32 to vector<8x128xf32>
    %16 = arith.addf %15, %14 : vector<8x128xf32>
    %17 = arith.mulf %11, %16 : vector<8x128xf32>
    %c0_9 = arith.constant 0 : index
    %c0_10 = arith.constant 0 : index
    %18 = vector.load %arg8[%c0_9, %c0_10] : memref<8x128xf32, #tpu.memory_space<vmem>>, vector<8x128xf32>
    %19 = arith.truncf %17 : vector<8x128xf32> to vector<8x128xbf16>
    %c0_11 = arith.constant 0 : index
    %c0_12 = arith.constant 0 : index
    %20 = vector.load %arg5[%c0_11, %c0_12] : memref<128x128xbf16, #tpu.memory_space<vmem>>, vector<128x128xbf16>
    %cst_13 = arith.constant dense<0.000000e+00> : vector<8x128xf32>
    %21 = tpu.matmul %19, %20, %cst_13 {dimension_numbers = #tpu.dot_dimension_numbers<[1], [0], [0], [1], [0, 0, 1, 1], [], []>} : vector<8x128xbf16>, vector<128x128xbf16>, vector<8x128xf32> -> vector<8x128xf32>
    %22 = arith.addf %18, %21 : vector<8x128xf32>
    %c0_14 = arith.constant 0 : index
    %c0_15 = arith.constant 0 : index
    %23 = vector.load %arg8[%c0_14, %c0_15] : memref<8x128xf32, #tpu.memory_space<vmem>>, vector<8x128xf32>
    tpu.vector_store %arg8[%c0_14, %c0_15], %22 {strides = array<i32>} : memref<8x128xf32, #tpu.memory_space<vmem>>, vector<8x128xf32>,
    %c0_i32_16 = arith.constant 0 : i32
    %24 = arith.cmpi eq, %arg1, %c0_i32_16 : i32
    %25 = arith.extui %24 : i1 to i32
    %c0_i32_17 = arith.constant 0 : i32
    %26 = arith.cmpi ne, %25, %c0_i32_17 : i32
    scf.if %26 {
      %c0_18 = arith.constant 0 : index
      %c0_19 = arith.constant 0 : index
      %27 = vector.load %arg8[%c0_18, %c0_19] : memref<8x128xf32, #tpu.memory_space<vmem>>, vector<8x128xf32>
      %c0_20 = arith.constant 0 : index
      %c0_21 = arith.constant 0 : index
      %28 = vector.load %arg6[%c0_20, %c0_21] : memref<1x128xf32, #tpu.memory_space<vmem>>, vector<1x128xf32>
      %29 = vector.broadcast %28 : vector<1x128xf32> to vector<8x128xf32>
      %30 = arith.addf %27, %29 : vector<8x128xf32>
      %c0_22 = arith.constant 0 : index
      %c0_23 = arith.constant 0 : index
      %31 = vector.load %arg7[%c0_22, %c0_23] : memref<8x128xf32, #tpu.memory_space<vmem>>, vector<8x128xf32>
      tpu.vector_store %arg7[%c0_22, %c0_23], %30 {strides = array<i32>} : memref<8x128xf32, #tpu.memory_space<vmem>>, vector<8x128xf32>,
    } else {
    }
    return
  }
  func.func @transform_0(%arg0: i32, %arg1: i32) -> (i32, i32) {
    %c0_i32 = arith.constant 0 : i32
    %c0_i32_0 = arith.constant 0 : i32
    return %arg0, %c0_i32 : i32, i32
  }
  func.func @transform_1(%arg0: i32, %arg1: i32) -> (i32, i32) {
    %c0_i32 = arith.constant 0 : i32
    %c0_i32_0 = arith.constant 0 : i32
    return %c0_i32, %arg1 : i32, i32
  }
  func.func @transform_2(%arg0: i32, %arg1: i32) -> (i32, i32) {
    %c0_i32 = arith.constant 0 : i32
    %c0_i32_0 = arith.constant 0 : i32
    return %c0_i32, %arg1 : i32, i32
  }
  func.func @transform_3(%arg0: i32, %arg1: i32) -> (i32, i32) {
    %c0_i32 = arith.constant 0 : i32
    %c0_i32_0 = arith.constant 0 : i32
    return %arg1, %c0_i32 : i32, i32
  }
  func.func @transform_4(%arg0: i32, %arg1: i32) -> (i32, i32) {
    %c0_i32 = arith.constant 0 : i32
    %c0_i32_0 = arith.constant 0 : i32
    %c0_i32_1 = arith.constant 0 : i32
    return %c0_i32, %c0_i32_0 : i32, i32
  }
  func.func @transform_5(%arg0: i32, %arg1: i32) -> (i32, i32) {
    %c0_i32 = arith.constant 0 : i32
    %c0_i32_0 = arith.constant 0 : i32
    return %arg0, %c0_i32 : i32, i32
  }
}

</mosaic_0001>

<bundles_post_ra>
// kernel: tpu_custom_call.1
= control target key start
LH: loop header
LB: loop body
LE: loop exit
PB: predicated region body
PF: predicated region fallthrough
CT: control target
= control target key end

     0   :  { %s1285_s0 = inlined_call_operand.hbm [shape: f32[16,128], index: 0, kind: input, shape index: {}]   ;;  %s1286_s1 = inlined_call_operand.hbm [shape: bf16[128,128], index: 1, kind: input, shape index: {}]   ;;  %s1287_s2 = inlined_call_operand.vmem [shape: f32[1,128], index: 2, kind: input, shape index: {}]   ;;  %s1288_s3 = inlined_call_operand.hbm [shape: bf16[128,128], index: 3, kind: input, shape index: {}]   ;;  %s1289_s4 = inlined_call_operand.vmem [shape: f32[1,128], index: 4, kind: input, shape index: {}]   ;;  %s1290_s5 = inlined_call_operand.hbm [shape: f32[16,128], index: 5, kind: output, shape index: {}]  }
   0x1   :  { %1294 = sst [smem:[#allocation13_spill]] %s1286_s1 }
   0x2   :  { %10 = vsyncpa [#allocation4], 0 }
   0x3   :  { %12 = vsyncpa [#allocation4 + $0x1], 0 }
   0x4   :  { %13 = vsyncpa [#allocation7], 0 }
   0x5   :  { %14 = vsyncpa [#allocation5], 0 }
   0x6   :  { %16 = vsyncpa [#allocation5 + $0x1], 0  ;;  %s1086_s18 = smov 0   ;;  %s1088_s19 = smov 0  }
   0x7   :  { %s1090_s20 = smov 0   ;;  %s1092_s21 = smov 0  }
   0x8   :  { %s1094_s22 = smov 0   ;;  %s1096_s23 = smov 0  }
   0x9 LB: > { %s683_s24 = sadd.s32 4294967295, %s1046_s23   ;;  %s684_s25 = sadd.s32 4294967294, %s1046_s23   ;;  %s1046_s23 = sphi %s1096_s23, %s22_s23   ;;  %s1042_s22 = sphi %s1094_s22, %s1312_s22   ;;  %s1038_s21 = sphi %s1092_s21, %s1311_s21   ;;  %s1034_s20 = sphi %s1090_s20, %s1310_s20   ;;  %s1030_s19 = sphi %s1088_s19, %s1309_s19   ;;  %s1026_s18 = sphi %s1086_s18, %s1308_s18  }
   0xa   : > { %p54_p0 = scmp.ne.s32.totalorder %s1030_s19, %s1026_s18  ;;  %p1120_p1 = scmp.eq.s32.totalorder %s683_s24, 0 }
   0xb   : > { %p1124_p2 = scmp.eq.s32.totalorder %s683_s24, 1  ;;  %p183_p3 = scmp.eq.s32.totalorder %s684_s25, 1 }
   0xc   : > { %s1295_s26 = scalar_select %p1120_p1, 1, 0 }
   0xd   : > { %p1130_p4 = por %p1120_p1, %p54_p0  ;;  %p685_p5 = scmp.ge.s32.totalorder %s1046_s23, 1 }
   0xe   : > { %p1135_p6 = por %p183_p3, %p54_p0  ;;  %p190_p7 = scmp.lt.s32.totalorder %s1046_s23, 3 }
   0xf   : > { %s1297_s28 = scalar_select %p1130_p4, 1, 0 }
  0x10   : > { %s1298_s29 = scalar_select %p1135_p6, 1, 0 }
  0x11   : > { %p1140_p8 = pnand %p685_p5, %p190_p7  ;;  %s1048_s6 = smov [#allocation6]  }
  0x12   : > { %s204_s7 = sshll.u32 %s1048_s6, 4  ;;  %s1049_s9 = smov [#allocation8]   ;;  %s205_s7 = int_to_ptr.vmem [resolvable:$true] %s204_s7 }
  0x13   : > { %p789_p9 = pneg %p1140_p8  ;;  %s226_s10 = sshll.u32 %s1049_s9, 4  ;;  %s227_s10 = int_to_ptr.vmem [resolvable:$true] %s226_s10 }
  0x14   : > { %s893_s11 = scalar_lea.vmem %s205_s7, 1024  ;;  %p901_p5 = scmp.lt.s32.totalorder %s205_s7, %s205_s7 }
  0x15   : > { %p1149_p11 = pnand %p789_p9, %p1120_p1  ;;  %p894_p13 = scmp.ne.s32.totalorder %s205_s7, %s893_s11 }
  0x16   : > { %p902_p7 = scmp.lt.s32.totalorder %s893_s11, %s893_s11 }
  0x17   : > { %p884_p12 = pneg %p1149_p11 }
  0x18   : > { %p903_p10 = por %p902_p7, %p901_p5 }
  0x19   : > { %p896_p0 = pnand %p894_p13, %p884_p12 }
  0x1b   : > { %p897_p3 = pneg %p896_p0 }
  0x1d   : > { %p904_p9 = pnand %p903_p10, %p897_p3 }
  0x1f   : > { %907 = shalt.err (!%p904_p9)
}
  0x20   : > { %s1050_s12 = smov 64   ;;  %s1051_s13 = smov 4  }
  0x21   : > { %s1301_s1 = sld [smem:[#allocation13_spill]]  ;;  %s919_s16 = scalar_lea.vmem %s227_s10, 1024 }
  0x22   : > { %p920_p6 = scmp.ne.s32.totalorder %s227_s10, %s919_s16  ;;  %p927_p1 = scmp.lt.s32.totalorder %s227_s10, %s227_s10 }
  0x23   : > { %p928_p4 = scmp.lt.s32.totalorder %s919_s16, %s919_s16 }
  0x24   : > { %p922_p13 = pnand %p920_p6, %p884_p12 }
  0x25   : > { %p929_p5 = por %p928_p4, %p927_p1 }
  0x26   : > { %p923_p0 = pneg %p922_p13 }
  0x27   : > { %792 = dma.hbm_to_vmem [thread:$0]  (!%p1149_p11), %s1301_s1, 1024, %s205_s7, [#allocation7], %s1050_s12, %s1050_s12, %s1051_s13  }
  0x28   : > { %p930_p10 = pnand %p929_p5, %p923_p0 }
  0x2a   : > { %933 = shalt.err (!%p930_p10)
}
  0x2b   : > { %795 = dma.hbm_to_vmem [thread:$0]  (!%p1149_p11), %s1288_s3, 1024, %s227_s10, [#allocation7], %s1050_s12, %s1050_s12, %s1051_s13  }
  0x2c   : > { %s34_s25 = sadd.s32 1, %s1042_s22  ;;  %s41_s6 = sadd.s32 1, %s1034_s20 }
  0x2d   : > { %p36_p1 = scmp.ge.s32.totalorder %s34_s25, 2  ;;  %p48_p4 = scmp.ne.s32.totalorder %s1034_s20, %s1030_s19 }
  0x2e   : > { %p49_p6 = scmp.eq.s32.totalorder %s1046_s23, 0  ;;  %p806_p12 = scmp.lt.s32.totalorder %s1046_s23, 2 }
  0x2f   : > { %s1314_s25 = smov (%p36_p1, %s34_s25), 0  ;;  %p1181_p7 = por %p1124_p2, %p48_p4 }
  0x30   : > { %p50_p3 = por %p49_p6, %p48_p4  ;;  %s38_s8 = ssub.s32 %s1042_s22, %s1314_s25 }
  0x31   : > { %s243_s9 = sand.u32 1, %s1034_s20   ;;  %p39_p9 = scmp.eq.s32.totalorder %s38_s8, 0 }
  0x32   : > { %s690_s10 = sshll.u32 %s243_s9, 3  ;;  %s691_s11 = sshll.u32 %s1042_s22, 7 }
  0x33   : > { %s1190_s12 = scalar_select %p39_p9, %s1034_s20, %s41_s6  }
  0x34   : > { %s252_s15 = scalar_lea.hbm %s1285_s0, %s691_s11  ;;  %s247_s16 = scalar_lea.vmem [#allocation3], %s690_s10 }
  0x35   : > { %s254_s17 = sshll.u32 %s247_s16, 4  ;;  %p1197_p11 = pnand %p806_p12, %p50_p3  ;;  %s255_s17 = int_to_ptr.vmem [resolvable:$true] %s254_s17 }
  0x36   : > { %s244_s24 = scalar_lea.sflag [#allocation4], %s243_s9  ;;  %s947_s8 = scalar_lea.vmem %s255_s17, 128 }
  0x37   : > { %p936_p2 = pneg %p1197_p11  ;;  %p948_p13 = scmp.ne.s32.totalorder %s255_s17, %s947_s8 }
  0x38   : > { %s1052_s6 = smov [#allocation3]  }
  0x39   : > { %p950_p0 = pnand %p948_p13, %p936_p2  ;;  %s952_s1 = sshll.u32 %s1052_s6, 4  ;;  %s953_s1 = int_to_ptr.vmem [resolvable:$false] %s952_s1 }
  0x3a   : > { %s954_s11 = scalar_lea.vmem %s953_s1, 256  ;;  %p955_p10 = scmp.lt.s32.totalorder %s255_s17, %s953_s1 }
  0x3b   : > { %p951_p5 = pneg %p950_p0  ;;  %p956_p1 = scmp.lt.s32.totalorder %s954_s11, %s947_s8 }
  0x3d   : > { %p957_p4 = por %p956_p1, %p955_p10 }
  0x3f   : > { %p958_p6 = pnand %p957_p4, %p951_p5 }
  0x41   : > { %961 = shalt.err (!%p958_p6)
}
  0x42   : > { %799 = dma.hbm_to_vmem [thread:$0]  (!%p1197_p11), %s252_s15, 128, %s255_s17, %s244_s24  }
  0x43   : > { %263 = sbr.rel (%p1140_p8) target bundleno = 536 (0x218), region = 40  ;;  %s1208_s9 = sand.u32 (!%p1140_p8), 1, %s1030_s19  }
  0x44   : > { %s693_s10 = sshll.u32 (!%p1140_p8), %s1208_s9, 3  ;;  %s266_s13 = scalar_lea.sflag (!%p1140_p8), [#allocation4], %s1208_s9 }
  0x45   : > { %s1214_s1 = scalar_lea.vmem (!%p1140_p8), [#allocation3], %s693_s10  ;;  %p1304_p12 = scmp.ne.s32.totalorder (!%p1140_p8), %s1297_s28, 0 }
  0x48   : > { %1013 = dma.done.wait (%p1304_p12), %s266_s13, 128  }
  0x49   : > { %1015 = vsyncadd (%p1304_p12), %s266_s13, 4294967168  ;;  %p1305_p3 = scmp.ne.s32.totalorder %s1295_s26, 0 }
  0x4b   : > { %1017 = dma.done.wait (%p1305_p3), [#allocation7], 2048  }
  0x4c   : > { %1019 = vsyncadd (%p1305_p3), [#allocation7], 4294965248  ;;  %v1053_v0 = vmov 0.0   ;;  %vm1054_vm0 = vmmov 0   ;;  %v864_v1 = vld [vmem:[#allocation6 + $0x38] sm:$0xff]   ;;  %v865_v2 = vld [vmem:[#allocation6 + $0x30] sm:$0xff]  }
  0x4d   : > { %737 = vmatprep.subr.bf16.mxu0 %v1053_v0  ;;  %753 = vmatprep.mubr.msk.bf16.mxu0 %vm1054_vm0, %v1053_v0  ;;  %v866_v3 = vld [vmem:[#allocation6 + $0x28] sm:$0xff]   ;;  %v872_v4 = vld [vmem:[#allocation8 + $0x38] sm:$0xff]   ;;  %v867_v5 = vld [vmem:[#allocation6 + $0x20] sm:$0xff]   ;;  %s716_s15 = sshll.u32 %s1038_s21, 7  ;;  %s306_s16 = scalar_lea.vmem [#allocation9], %s693_s10 }
  0x4e   : > { %757 = vmatprep.subr.bf16.mxu1 %v1053_v0  ;;  %773 = vmatprep.mubr.msk.bf16.mxu1 %vm1054_vm0, %v1053_v0  ;;  %v873_v6 = vld [vmem:[#allocation8 + $0x30] sm:$0xff]   ;;  %v868_v7 = vld [vmem:[#allocation6 + $0x18] sm:$0xff]   ;;  %v870_v9 = vld [vmem:[#allocation6 + $0x8] sm:$0xff]   ;;  %s570_s17 = sshll.u32 %s306_s16, 4  ;;  %s1237_s8 = scalar_lea.hbm %s1290_s5, %s716_s15  ;;  %s1239_s17 = int_to_ptr.vmem [resolvable:$true] %s570_s17 }
  0x4f   : > { %738 = vmatpush3.bf16.msra.mxu0 %v864_v1  ;;  %758 = vmatpush3.bf16.msra.mxu1 %v872_v4  ;;  %v869_v8 = vld [vmem:[#allocation6 + $0x10] sm:$0xff]   ;;  %v871_v10 = vld [vmem:[#allocation6] sm:$0xff]   ;;  %v874_v13 = vld [vmem:[#allocation8 + $0x28] sm:$0xff]   ;;  %s557_s6 = scalar_lea.sflag [#allocation5], %s1208_s9  ;;  %s962_s21 = scalar_lea.vmem %s1239_s17, 128 }
  0x50   : > { %739 = vmatprep.subr.bf16.mxu0 %v1053_v0  ;;  %759 = vmatprep.subr.bf16.mxu1 %v1053_v0  ;;  %v317_v11 = vld [vmem:[%s1214_s1] sm:$0xff]  ;;  %v875_v14 = vld [vmem:[#allocation8 + $0x20] sm:$0xff]   ;;  %v878_v17 = vld [vmem:[#allocation8 + $0x8] sm:$0xff]   ;;  %p963_p8 = scmp.ne.s32.totalorder %s1239_s17, %s962_s21  ;;  %s1055_s11 = smov [#allocation9]  }
  0x51   : > { %v318_v12 = vpack.c.bf16 %v317_v11, %v317_v11  ;;  %v876_v15 = vld [vmem:[#allocation8 + $0x18] sm:$0xff]   ;;  %v877_v16 = vld [vmem:[#allocation8 + $0x10] sm:$0xff]   ;;  %v879_v18 = vld [vmem:[#allocation8] sm:$0xff]   ;;  %s966_s10 = sshll.u32 %s1055_s11, 4  ;;  %s967_s10 = int_to_ptr.vmem [resolvable:$false] %s966_s10 }
  0x52   : > { %v697_v19 = vld [vmem:[%s1287_s2] ss:$0 sm:$0xff]  ;;  %p964_p9 = pnand %p963_p8, %p1181_p7  ;;  %s968_s13 = scalar_lea.vmem %s967_s10, 256 }
  0x53   : > { %740 = vmatpush3.bf16.msra.mxu0 %v865_v2  ;;  %760 = vmatpush3.bf16.msra.mxu1 %v873_v6  ;;  %v714_v31 = vld [vmem:[%s1289_s4] ss:$0 sm:$0xff]  ;;  %p969_p2 = scmp.lt.s32.totalorder %s1239_s17, %s967_s10  ;;  %p970_p13 = scmp.lt.s32.totalorder %s968_s13, %s962_s21 }
  0x54   : > { %741 = vmatprep.subr.bf16.mxu0 %v1053_v0  ;;  %761 = vmatprep.subr.bf16.mxu1 %v1053_v0  ;;  %p965_p11 = pneg %p964_p9 }
  0x55   : > { %p971_p0 = por %p970_p13, %p969_p2 }
  0x57   : > { %742 = vmatpush3.bf16.msra.mxu0 %v866_v3  ;;  %762 = vmatpush3.bf16.msra.mxu1 %v874_v13  ;;  %p972_p5 = pnand %p971_p0, %p965_p11 }
  0x58   : > { %743 = vmatprep.subr.bf16.mxu0 %v1053_v0  ;;  %763 = vmatprep.subr.bf16.mxu1 %v1053_v0 }
  0x5b   : > { %744 = vmatpush3.bf16.msra.mxu0 %v867_v5  ;;  %764 = vmatpush3.bf16.msra.mxu1 %v875_v14 }
  0x5c   : > { %745 = vmatprep.subr.bf16.mxu0 %v1053_v0  ;;  %765 = vmatprep.subr.bf16.mxu1 %v1053_v0 }
  0x5f   : > { %746 = vmatpush3.bf16.msra.mxu0 %v868_v7  ;;  %766 = vmatpush3.bf16.msra.mxu1 %v876_v15 }
  0x60   : > { %747 = vmatprep.subr.bf16.mxu0 %v1053_v0  ;;  %767 = vmatprep.subr.bf16.mxu1 %v1053_v0 }
  0x63   : > { %748 = vmatpush3.bf16.msra.mxu0 %v869_v8  ;;  %768 = vmatpush3.bf16.msra.mxu1 %v877_v16 }
  0x64   : > { %749 = vmatprep.subr.bf16.mxu0 %v1053_v0  ;;  %769 = vmatprep.subr.bf16.mxu1 %v1053_v0 }
  0x67   : > { %750 = vmatpush3.bf16.msra.mxu0 %v870_v9  ;;  %770 = vmatpush3.bf16.msra.mxu1 %v878_v17 }
  0x68   : > { %751 = vmatprep.subr.bf16.mxu0 %v1053_v0  ;;  %771 = vmatprep.subr.bf16.mxu1 %v1053_v0 }
  0x6b   : > { %752 = vmatpush3.bf16.msra.mxu0 %v871_v10  ;;  %772 = vmatpush3.bf16.msra.mxu1 %v879_v18 }
  0x6e   : > { %754 = vmatmul.mubr.bf16.vlgmr.msra.gmra.mxu0 %v318_v12 }
 0x12e   : > { %v424_v20 = vpop.f32.mrf.mxu0 }
 0x12f   : > { %v425_v21 = vadd.f32 %v697_v19, %v424_v20 }
 0x130   : > { %v755_v22 = vpop.f32.mrf.mxu0 }
 0x131   : > { %v431_v23 = vmul.f32 0.70710677, %v425_v21  ;;  %v430_v27 = vmul.f32 0.5, %v425_v21 }
 0x132   : > { %v427_v24 = vpop.f32.mrf.mxu0 }
 0x133   : > { %880 = verf.f32 %v431_v23 }
 0x134   : > { %v756_v25 = vpop.f32.mrf.mxu0 }
 0x140   : > { %v881_v26 = vpop.eup %880 }
 0x141   : > { %v433_v28 = vadd.f32 1.0, %v881_v26 }
 0x143   : > { %v434_v29 = vmul.f32 %v433_v28, %v430_v27 }
 0x145   : > { %v436_v30 = vpack.c.bf16 %v434_v29, %v434_v29 }
 0x147   : > { %774 = vmatmul.mubr.bf16.vlgmr.msra.gmra.mxu1 %v436_v30 }
 0x207   : > { %v535_v32 = vpop.f32.mrf.mxu1 }
 0x208   : > { %v554_v33 = vadd.f32 %v714_v31, %v535_v32 }
 0x209   : > { %v775_v34 = vpop.f32.mrf.mxu1 }
 0x20a   : > { %555 = vst [vmem:[%s306_s16] sm:$0xff] %v554_v33 }
 0x20b   : > { %v538_v35 = vpop.f32.mrf.mxu1 }
 0x20c   : > { %975 = shalt.err (!%p972_p5)
}
 0x20d   : > { %s976_s1 = scalar_lea.hbm %s1237_s8, 128  ;;  %s980_s28 = scalar_lea.hbm %s1290_s5, 256 }
 0x20e   : > { %p977_p10 = scmp.ne.s32.totalorder %s1237_s8, %s976_s1  ;;  %p981_p6 = scmp.lt.s32.totalorder %s1237_s8, %s1290_s5 }
 0x20f   : > { %p982_p12 = scmp.lt.s32.totalorder %s980_s28, %s976_s1 }
 0x210   : > { %p978_p1 = pnand %p977_p10, %p1181_p7 }
 0x211   : > { %p983_p3 = por %p982_p12, %p981_p6 }
 0x212   : > { %p979_p4 = pneg %p978_p1 }
 0x214   : > { %p984_p8 = pnand %p983_p3, %p979_p4 }
 0x216   : > { %987 = shalt.err (!%p984_p8)
}
 0x217   : > { %787 = dma.vmem_to_hbm [thread:$0]  (%p1181_p7), %s1239_s17, 128, %s1237_s8, %s557_s6   ;;  %v776_v36 = vpop.f32.mrf.mxu1 }
 0x218 PF: > { %s582_s15 = sand.u32 1, %s1026_s18   ;;  %p1306_p9 = scmp.ne.s32.totalorder %s1298_s29, 0 }
 0x219   : > { %p1307_p11 = scmp.ge.s32.totalorder %s1046_s23, 2  ;;  %s583_s16 = scalar_lea.sflag [#allocation5], %s582_s15 }
 0x21b   : > { %p801_p2 = pnand %p1307_p11, %p1306_p9 }
 0x21d   : > { %p802_p13 = pneg %p801_p2 }
 0x21f   : > { %1021 = dma.done.wait (%p802_p13), %s583_s16, 128  }
 0x220   : > { %1023 = vsyncadd (%p802_p13), %s583_s16, 4294967168  ;;  %s22_s23 = sadd.s32 1, %s1046_s23   ;;  %s1308_s18 = smov %s1030_s19 }
 0x221   : > { %p19_p0 = scmp.ge.s32.totalorder %s22_s23, 4   ;;  %s1309_s19 = smov %s1034_s20 }
 0x222   : > { %s1310_s20 = smov %s1190_s12  ;;  %s1311_s21 = smov %s1042_s22 }
 0x223   : > { %s1312_s22 = smov %s1314_s25  ;;  %21 = sbr.rel (!%p19_p0) target bundleno = 9 (0x9), region = 106 }
 0x228   :  { %588 = vsyncpa [#allocation4], 1 }
 0x229   :  { %590 = vsyncpa [#allocation4 + $0x1], 1 }
 0x22a   :  { %591 = vsyncpa [#allocation7], 1 }
 0x22b   :  { %592 = vsyncpa [#allocation5], 1 }
 0x22c   :  { %594 = vsyncpa [#allocation5 + $0x1], 1 }

</bundles_post_ra>
